<compile_context>
chip_gen: v7x
topology: tpu7x:2x2x1
jax: 0.10.0
libtpu: 0.0.40
codegen_flags: <defaults>
</compile_context>

<pallas_src>
import math

import jax
import jax.numpy as jnp
from jax import lax
from jax.experimental import pallas as pl
from jax.experimental.pallas import tpu as pltpu  # noqa: F401  (TPU backend)

# ---------------- model config (small, consistent with the module) ----------------
B = 2          # batch
T = 8          # n_ctx / sequence length
C = 32         # n_embd
H = 4          # n_head
D = C // H     # head dim
BT = B * T
EPS = 1e-5     # layer_norm_epsilon
SCALE = False  # Attention(..., scale=False) — module default


def _layernorm(h, g, b):
    mu = jnp.mean(h, axis=-1, keepdims=True)
    var = jnp.mean((h - mu) ** 2, axis=-1, keepdims=True)
    return (h - mu) * lax.rsqrt(var + EPS) * g + b


def _gelu_new(x):
    # GPT-2 "gelu_new" (tanh approximation)
    return 0.5 * x * (1.0 + jnp.tanh(
        math.sqrt(2.0 / math.pi) * (x + 0.044715 * x * x * x)))


def gpt2_block_kernel(x_ref, wqkv_ref, wpr_ref, wfc_ref, wmp_ref, mask_ref,
                      bqkv_ref, bfc_ref, bvec_ref, out_ref, pkv_ref):
    x = x_ref[...]                       # (BT, C) f32
    bv = bvec_ref[...]                   # (8, C) f32, row-indexed (sublane slices)
    ln1g, ln1b = bv[0:1, :], bv[1:2, :]
    bpr = bv[2:3, :]
    ln2g, ln2b = bv[3:4, :], bv[4:5, :]
    bmp = bv[5:6, :]

    # ---- ln_1 + c_attn (Conv1D: x @ W + b), batch*seq folded into rows ----
    h1 = _layernorm(x, ln1g, ln1b)
    qkv = jnp.dot(h1.astype(jnp.bfloat16), wqkv_ref[...],
                  preferred_element_type=jnp.float32) + bqkv_ref[...]     # (BT, 3C)

    # present (k|v): single lane-dense (BT, 2C) store; head split done in wrapper
    pkv_ref[...] = qkv[:, C:3 * C]

    # ---- attention, batched over heads (single code path, no per-batch loop) ----
    q = qkv[:, 0 * C:1 * C].reshape(BT, H, D).transpose(1, 0, 2)   # (H, BT, D)
    k = qkv[:, 1 * C:2 * C].reshape(BT, H, D).transpose(1, 0, 2)
    v = qkv[:, 2 * C:3 * C].reshape(BT, H, D).transpose(1, 0, 2)

    s = jnp.einsum('hqd,hkd->hqk',
                   q.astype(jnp.bfloat16), k.astype(jnp.bfloat16),
                   preferred_element_type=jnp.float32)                    # (H, BT, BT)
    if SCALE:
        s = s * (1.0 / math.sqrt(D))

    # precomputed additive block-diagonal causal mask (invalid -> -1e4)
    s = s + mask_ref[...]

    # softmax(dim=-1); divide via EUP approx reciprocal
    s = s - jnp.max(s, axis=-1, keepdims=True)
    e = jnp.exp(s)
    p = e * pl.reciprocal(jnp.sum(e, axis=-1, keepdims=True), approx=True)
    # attn_dropout: identity in eval mode

    a = jnp.einsum('hqk,hkd->hqd',
                   p.astype(jnp.bfloat16), v.astype(jnp.bfloat16),
                   preferred_element_type=jnp.float32)                    # (H, BT, D)

    # ---- merge_heads + c_proj folded: sum_h a[h] @ wpr[h*D:(h+1)*D, :] ----
    aproj = jnp.sum(
        jnp.einsum('hqd,hdc->hqc', a.astype(jnp.bfloat16), wpr_ref[...],
                   preferred_element_type=jnp.float32), axis=0) + bpr     # (BT, C)
    # resid_dropout: identity in eval mode
    x1 = x + aproj

    # ---- ln_2 + MLP (c_fc, gelu_new, c_proj) + residual ----
    h2 = _layernorm(x1, ln2g, ln2b)
    f = _gelu_new(jnp.dot(h2.astype(jnp.bfloat16), wfc_ref[...],
                          preferred_element_type=jnp.float32) + bfc_ref[...])  # (BT, 4C)
    m = jnp.dot(f.astype(jnp.bfloat16), wmp_ref[...],
                preferred_element_type=jnp.float32) + bmp                 # (BT, C)
    # mlp dropout: identity in eval mode
    out_ref[...] = x1 + m


def prepare_params(params):
    """One-time parameter packing/casting (hoisted OUT of the forward path)."""
    (ln1g, ln1b, wqkv, bqkv, wpr, bpr, ln2g, ln2b, wfc, bfc, wmp, bmp) = params
    wqkv_b = jnp.asarray(wqkv, jnp.bfloat16)                    # (C, 3C)
    wpr3_b = jnp.asarray(wpr, jnp.bfloat16).reshape(H, D, C)    # (H, D, C) head-grouped rows
    wfc_b = jnp.asarray(wfc, jnp.bfloat16)                      # (C, 4C)
    wmp_b = jnp.asarray(wmp, jnp.bfloat16)                      # (4C, C)
    bvec = jnp.concatenate(
        [ln1g, ln1b, bpr, ln2g, ln2b, bmp, jnp.zeros((2, C), jnp.float32)],
        axis=0)                                                 # (8, C) row-indexed
    # additive block-diagonal causal mask over the flattened (B*T) token axis
    idx = jnp.arange(BT)
    same_batch = (idx[:, None] // T) == (idx[None, :] // T)
    causal = (idx[None, :] % T) <= (idx[:, None] % T)
    mask_add = jnp.where(same_batch & causal, 0.0, -10000.0).astype(jnp.float32)  # (BT, BT)
    return (wqkv_b, wpr3_b, wfc_b, wmp_b, mask_add,
            jnp.asarray(bqkv, jnp.float32), jnp.asarray(bfc, jnp.float32), bvec)


@jax.jit
def custom_gpt2_block(x, prepped):
    """x: [B, T, C] float32. Returns (hidden [B,T,C], present [2,B,H,T,D])."""
    wqkv_b, wpr3_b, wfc_b, wmp_b, mask_add, bqkv, bfc, bvec = prepped
    out2, pkv = pl.pallas_call(
        gpt2_block_kernel,
        out_shape=(
            jax.ShapeDtypeStruct((BT, C), jnp.float32),
            jax.ShapeDtypeStruct((BT, 2 * C), jnp.float32),
        ),
    )(x.reshape(BT, C), wqkv_b, wpr3_b, wfc_b, wmp_b, mask_add, bqkv, bfc, bvec)

    out = out2.reshape(B, T, C)
    # head split / stack for "present" done outside the kernel (layout plumbing)
    present = pkv.reshape(B, T, 2, H, D).transpose(2, 0, 3, 1, 4)   # (2,B,H,T,D)
    return out, present


# ---------------- pure-JAX reference (for correctness check) ----------------
def reference_block(x, params):
    (ln1g, ln1b, wqkv, bqkv, wpr, bpr, ln2g, ln2b, wfc, bfc, wmp, bmp) = params
    h1 = _layernorm(x, ln1g, ln1b)
    qkv = h1 @ wqkv + bqkv
    q, k, v = jnp.split(qkv, 3, axis=-1)
    sh = lambda t: t.reshape(B, T, H, D).transpose(0, 2, 1, 3)   # (B,H,T,D)
    q, k, v = sh(q), sh(k), sh(v)
    w = jnp.einsum('bhtd,bhsd->bhts', q, k)
    if SCALE:
        w = w / math.sqrt(D)
    bmask = jnp.tril(jnp.ones((T, T), jnp.float32))
    w = w * bmask - 10000.0 * (1.0 - bmask)
    w = jax.nn.softmax(w, axis=-1)
    a = jnp.einsum('bhts,bhsd->bhtd', w, v)
    a = a.transpose(0, 2, 1, 3).reshape(B, T, C)
    a = a @ wpr + bpr
    x1 = x + a
    h2 = _layernorm(x1, ln2g, ln2b)
    m = _gelu_new(h2 @ wfc + bfc) @ wmp + bmp
    present = jnp.stack([k, v], axis=0)
    return x1 + m, present


if __name__ == "__main__":
    key = jax.random.PRNGKey(0)
    ks = jax.random.split(key, 6)

    # deterministic synthetic parameters (GPT-2-style init: N(0, 0.02), zero bias)
    ln1g = jnp.ones((1, C), jnp.float32)
    ln1b = jnp.zeros((1, C), jnp.float32)
    ln2g = jnp.ones((1, C), jnp.float32)
    ln2b = jnp.zeros((1, C), jnp.float32)
    wqkv = 0.02 * jax.random.normal(ks[0], (C, 3 * C), jnp.float32)
    bqkv = jnp.zeros((1, 3 * C), jnp.float32)
    wpr = 0.02 * jax.random.normal(ks[1], (C, C), jnp.float32)
    bpr = jnp.zeros((1, C), jnp.float32)
    wfc = 0.02 * jax.random.normal(ks[2], (C, 4 * C), jnp.float32)
    bfc = jnp.zeros((1, 4 * C), jnp.float32)
    wmp = 0.02 * jax.random.normal(ks[3], (4 * C, C), jnp.float32)
    bmp = jnp.zeros((1, C), jnp.float32)
    params = (ln1g, ln1b, wqkv, bqkv, wpr, bpr, ln2g, ln2b, wfc, bfc, wmp, bmp)

    # one-time packing (NOT in the per-call forward path)
    prepped = jax.tree_util.tree_map(jax.block_until_ready, prepare_params(params))

    x = jax.random.normal(ks[4], (B, T, C), jnp.float32)

    out, present = custom_gpt2_block(x, prepped)
    out = jax.block_until_ready(out)
    present = jax.block_until_ready(present)

    ref_out, ref_present = reference_block(x, params)
    assert jnp.allclose(out, ref_out, atol=1e-2, rtol=1e-2), "hidden mismatch"
    assert jnp.allclose(present, ref_present, atol=1e-2, rtol=1e-2), "present mismatch"

    # TODO(synk): layer_past / attention_mask / head_mask / layer_extra branches
    # (all default to None in the module signature) are not implemented.
    print("KERNEL_OK")
</pallas_src>

<mosaic_0001>
module attributes {stable_mosaic.version = 11 : i64} {
  func.func @gpt2_block_kernel(%arg0: memref<16x32xf32, #tpu.memory_space<vmem>>, %arg1: memref<32x96xbf16, #tpu.memory_space<vmem>>, %arg2: memref<4x8x32xbf16, #tpu.memory_space<vmem>>, %arg3: memref<32x128xbf16, #tpu.memory_space<vmem>>, %arg4: memref<128x32xbf16, #tpu.memory_space<vmem>>, %arg5: memref<16x16xf32, #tpu.memory_space<vmem>>, %arg6: memref<1x96xf32, #tpu.memory_space<vmem>>, %arg7: memref<1x128xf32, #tpu.memory_space<vmem>>, %arg8: memref<8x32xf32, #tpu.memory_space<vmem>>, %arg9: memref<16x32xf32, #tpu.memory_space<vmem>>, %arg10: memref<16x64xf32, #tpu.memory_space<vmem>>) attributes {dimension_semantics = [], scalar_prefetch = 0 : i64, scratch_operands = 0 : i64, tpu.core_type = #tpu.core_type<tc>} {
    %c0 = arith.constant 0 : index
    %c0_0 = arith.constant 0 : index
    %0 = vector.load %arg0[%c0, %c0_0] : memref<16x32xf32, #tpu.memory_space<vmem>>, vector<16x32xf32>
    %c0_1 = arith.constant 0 : index
    %c0_2 = arith.constant 0 : index
    %1 = vector.load %arg8[%c0_1, %c0_2] : memref<8x32xf32, #tpu.memory_space<vmem>>, vector<8x32xf32>
    %2 = vector.extract_strided_slice %1 {offsets = [0, 0], sizes = [1, 32], strides = [1, 1]} : vector<8x32xf32> to vector<1x32xf32>
    %3 = vector.extract_strided_slice %1 {offsets = [1, 0], sizes = [1, 32], strides = [1, 1]} : vector<8x32xf32> to vector<1x32xf32>
    %4 = vector.extract_strided_slice %1 {offsets = [2, 0], sizes = [1, 32], strides = [1, 1]} : vector<8x32xf32> to vector<1x32xf32>
    %5 = vector.extract_strided_slice %1 {offsets = [3, 0], sizes = [1, 32], strides = [1, 1]} : vector<8x32xf32> to vector<1x32xf32>
    %6 = vector.extract_strided_slice %1 {offsets = [4, 0], sizes = [1, 32], strides = [1, 1]} : vector<8x32xf32> to vector<1x32xf32>
    %7 = vector.extract_strided_slice %1 {offsets = [5, 0], sizes = [1, 32], strides = [1, 1]} : vector<8x32xf32> to vector<1x32xf32>
    %cst = arith.constant dense<0.000000e+00> : vector<16xf32>
    %8 = vector.multi_reduction <add>, %0, %cst [1] : vector<16x32xf32> to vector<16xf32>
    %9 = vector.shape_cast %8 : vector<16xf32> to vector<16x1xf32>
    %cst_3 = arith.constant 3.200000e+01 : f32
    %10 = vector.broadcast %cst_3 : f32 to vector<16x1xf32>
    %11 = arith.divf %9, %10 : vector<16x1xf32>
    %12 = vector.broadcast %11 : vector<16x1xf32> to vector<16x32xf32>
    %13 = arith.subf %0, %12 : vector<16x32xf32>
    %14 = arith.mulf %13, %13 : vector<16x32xf32>
    %cst_4 = arith.constant dense<0.000000e+00> : vector<16xf32>
    %15 = vector.multi_reduction <add>, %14, %cst_4 [1] : vector<16x32xf32> to vector<16xf32>
    %16 = vector.shape_cast %15 : vector<16xf32> to vector<16x1xf32>
    %cst_5 = arith.constant 3.200000e+01 : f32
    %17 = vector.broadcast %cst_5 : f32 to vector<16x1xf32>
    %18 = arith.divf %16, %17 : vector<16x1xf32>
    %19 = vector.broadcast %11 : vector<16x1xf32> to vector<16x32xf32>
    %20 = arith.subf %0, %19 : vector<16x32xf32>
    %cst_6 = arith.constant 9.99999974E-6 : f32
    %21 = vector.broadcast %cst_6 : f32 to vector<16x1xf32>
    %22 = arith.addf %18, %21 : vector<16x1xf32>
    %23 = math.rsqrt %22 : vector<16x1xf32>
    %24 = vector.broadcast %23 : vector<16x1xf32> to vector<16x32xf32>
    %25 = arith.mulf %20, %24 : vector<16x32xf32>
    %26 = vector.broadcast %2 : vector<1x32xf32> to vector<16x32xf32>
    %27 = arith.mulf %25, %26 : vector<16x32xf32>
    %28 = vector.broadcast %3 : vector<1x32xf32> to vector<16x32xf32>
    %29 = arith.addf %27, %28 : vector<16x32xf32>
    %30 = arith.truncf %29 : vector<16x32xf32> to vector<16x32xbf16>
    %c0_7 = arith.constant 0 : index
    %c0_8 = arith.constant 0 : index
    %31 = vector.load %arg1[%c0_7, %c0_8] : memref<32x96xbf16, #tpu.memory_space<vmem>>, vector<32x96xbf16>
    %cst_9 = arith.constant dense<0.000000e+00> : vector<16x96xf32>
    %32 = tpu.matmul %30, %31, %cst_9 {dimension_numbers = #tpu.dot_dimension_numbers<[1], [0], [0], [1], [0, 0, 1, 1], [], []>} : vector<16x32xbf16>, vector<32x96xbf16>, vector<16x96xf32> -> vector<16x96xf32>
    %c0_10 = arith.constant 0 : index
    %c0_11 = arith.constant 0 : index
    %33 = vector.load %arg6[%c0_10, %c0_11] : memref<1x96xf32, #tpu.memory_space<vmem>>, vector<1x96xf32>
    %34 = vector.broadcast %33 : vector<1x96xf32> to vector<16x96xf32>
    %35 = arith.addf %32, %34 : vector<16x96xf32>
    %36 = vector.extract_strided_slice %35 {offsets = [0, 32], sizes = [16, 64], strides = [1, 1]} : vector<16x96xf32> to vector<16x64xf32>
    %c0_12 = arith.constant 0 : index
    %c0_13 = arith.constant 0 : index
    %37 = vector.load %arg10[%c0_12, %c0_13] : memref<16x64xf32, #tpu.memory_space<vmem>>, vector<16x64xf32>
    tpu.vector_store %arg10[%c0_12, %c0_13], %36 {strides = array<i32>} : memref<16x64xf32, #tpu.memory_space<vmem>>, vector<16x64xf32>,
    %38 = vector.extract_strided_slice %35 {offsets = [0, 0], sizes = [16, 32], strides = [1, 1]} : vector<16x96xf32> to vector<16x32xf32>
    %39 = vector.shape_cast %38 : vector<16x32xf32> to vector<16x4x8xf32>
    %40 = tpu.transpose %39, [1, 0, 2] : vector<16x4x8xf32> -> vector<4x16x8xf32>
    %41 = vector.extract_strided_slice %35 {offsets = [0, 32], sizes = [16, 32], strides = [1, 1]} : vector<16x96xf32> to vector<16x32xf32>
    %42 = vector.shape_cast %41 : vector<16x32xf32> to vector<16x4x8xf32>
    %43 = tpu.transpose %42, [1, 0, 2] : vector<16x4x8xf32> -> vector<4x16x8xf32>
    %44 = vector.extract_strided_slice %35 {offsets = [0, 64], sizes = [16, 32], strides = [1, 1]} : vector<16x96xf32> to vector<16x32xf32>
    %45 = vector.shape_cast %44 : vector<16x32xf32> to vector<16x4x8xf32>
    %46 = tpu.transpose %45, [1, 0, 2] : vector<16x4x8xf32> -> vector<4x16x8xf32>
    %47 = arith.truncf %40 : vector<4x16x8xf32> to vector<4x16x8xbf16>
    %48 = arith.truncf %43 : vector<4x16x8xf32> to vector<4x16x8xbf16>
    "tpu.trace_start"() <{level = 10 : i32, message = "hqd,hkd->hqk"}> : () -> ()
    %cst_14 = arith.constant dense<0.000000e+00> : vector<4x16x16xf32>
    %49 = tpu.matmul %47, %48, %cst_14 {dimension_numbers = #tpu.dot_dimension_numbers<[2], [2], [1], [1], [0, 0, 0, 1, 1, 1], [0], [0]>} : vector<4x16x8xbf16>, vector<4x16x8xbf16>, vector<4x16x16xf32> -> vector<4x16x16xf32>
    "tpu.trace_stop"() : () -> ()
    %c0_15 = arith.constant 0 : index
    %c0_16 = arith.constant 0 : index
    %50 = vector.load %arg5[%c0_15, %c0_16] : memref<16x16xf32, #tpu.memory_space<vmem>>, vector<16x16xf32>
    %51 = vector.shape_cast %50 : vector<16x16xf32> to vector<1x16x16xf32>
    %52 = vector.broadcast %51 : vector<1x16x16xf32> to vector<4x16x16xf32>
    %53 = arith.addf %49, %52 : vector<4x16x16xf32>
    %cst_17 = arith.constant dense<0xFF800000> : vector<4x16xf32>
    %54 = vector.multi_reduction <maximumf>, %53, %cst_17 [2] : vector<4x16x16xf32> to vector<4x16xf32>
    %55 = vector.shape_cast %54 : vector<4x16xf32> to vector<4x16x1xf32>
    %56 = vector.broadcast %55 : vector<4x16x1xf32> to vector<4x16x16xf32>
    %57 = arith.subf %53, %56 : vector<4x16x16xf32>
    %58 = math.exp %57 : vector<4x16x16xf32>
    %cst_18 = arith.constant dense<0.000000e+00> : vector<4x16xf32>
    %59 = vector.multi_reduction <add>, %58, %cst_18 [2] : vector<4x16x16xf32> to vector<4x16xf32>
    %60 = vector.shape_cast %59 : vector<4x16xf32> to vector<4x16x1xf32>
    %61 = tpu.reciprocal %60 {approx = true} : vector<4x16x1xf32> -> vector<4x16x1xf32>
    %62 = vector.broadcast %61 : vector<4x16x1xf32> to vector<4x16x16xf32>
    %63 = arith.mulf %58, %62 : vector<4x16x16xf32>
    %64 = arith.truncf %63 : vector<4x16x16xf32> to vector<4x16x16xbf16>
    %65 = arith.truncf %46 : vector<4x16x8xf32> to vector<4x16x8xbf16>
    "tpu.trace_start"() <{level = 10 : i32, message = "hqk,hkd->hqd"}> : () -> ()
    %cst_19 = arith.constant dense<0.000000e+00> : vector<4x16x8xf32>
    %66 = tpu.matmul %64, %65, %cst_19 {dimension_numbers = #tpu.dot_dimension_numbers<[2], [1], [1], [2], [0, 0, 0, 1, 1, 2], [0], [0]>} : vector<4x16x16xbf16>, vector<4x16x8xbf16>, vector<4x16x8xf32> -> vector<4x16x8xf32>
    "tpu.trace_stop"() : () -> ()
    %67 = arith.truncf %66 : vector<4x16x8xf32> to vector<4x16x8xbf16>
    %c0_20 = arith.constant 0 : index
    %c0_21 = arith.constant 0 : index
    %c0_22 = arith.constant 0 : index
    %68 = vector.load %arg2[%c0_20, %c0_21, %c0_22] : memref<4x8x32xbf16, #tpu.memory_space<vmem>>, vector<4x8x32xbf16>
    "tpu.trace_start"() <{level = 10 : i32, message = "hqd,hdc->hqc"}> : () -> ()
    %cst_23 = arith.constant dense<0.000000e+00> : vector<4x16x32xf32>
    %69 = tpu.matmul %67, %68, %cst_23 {dimension_numbers = #tpu.dot_dimension_numbers<[2], [1], [1], [2], [0, 0, 0, 1, 1, 2], [0], [0]>} : vector<4x16x8xbf16>, vector<4x8x32xbf16>, vector<4x16x32xf32> -> vector<4x16x32xf32>
    "tpu.trace_stop"() : () -> ()
    %cst_24 = arith.constant dense<0.000000e+00> : vector<16x32xf32>
    %70 = vector.multi_reduction <add>, %69, %cst_24 [0] : vector<4x16x32xf32> to vector<16x32xf32>
    %71 = vector.broadcast %4 : vector<1x32xf32> to vector<16x32xf32>
    %72 = arith.addf %70, %71 : vector<16x32xf32>
    %73 = arith.addf %0, %72 : vector<16x32xf32>
    %cst_25 = arith.constant dense<0.000000e+00> : vector<16xf32>
    %74 = vector.multi_reduction <add>, %73, %cst_25 [1] : vector<16x32xf32> to vector<16xf32>
    %75 = vector.shape_cast %74 : vector<16xf32> to vector<16x1xf32>
    %cst_26 = arith.constant 3.200000e+01 : f32
    %76 = vector.broadcast %cst_26 : f32 to vector<16x1xf32>
    %77 = arith.divf %75, %76 : vector<16x1xf32>
    %78 = vector.broadcast %77 : vector<16x1xf32> to vector<16x32xf32>
    %79 = arith.subf %73, %78 : vector<16x32xf32>
    %80 = arith.mulf %79, %79 : vector<16x32xf32>
    %cst_27 = arith.constant dense<0.000000e+00> : vector<16xf32>
    %81 = vector.multi_reduction <add>, %80, %cst_27 [1] : vector<16x32xf32> to vector<16xf32>
    %82 = vector.shape_cast %81 : vector<16xf32> to vector<16x1xf32>
    %cst_28 = arith.constant 3.200000e+01 : f32
    %83 = vector.broadcast %cst_28 : f32 to vector<16x1xf32>
    %84 = arith.divf %82, %83 : vector<16x1xf32>
    %85 = vector.broadcast %77 : vector<16x1xf32> to vector<16x32xf32>
    %86 = arith.subf %73, %85 : vector<16x32xf32>
    %cst_29 = arith.constant 9.99999974E-6 : f32
    %87 = vector.broadcast %cst_29 : f32 to vector<16x1xf32>
    %88 = arith.addf %84, %87 : vector<16x1xf32>
    %89 = math.rsqrt %88 : vector<16x1xf32>
    %90 = vector.broadcast %89 : vector<16x1xf32> to vector<16x32xf32>
    %91 = arith.mulf %86, %90 : vector<16x32xf32>
    %92 = vector.broadcast %5 : vector<1x32xf32> to vector<16x32xf32>
    %93 = arith.mulf %91, %92 : vector<16x32xf32>
    %94 = vector.broadcast %6 : vector<1x32xf32> to vector<16x32xf32>
    %95 = arith.addf %93, %94 : vector<16x32xf32>
    %96 = arith.truncf %95 : vector<16x32xf32> to vector<16x32xbf16>
    %c0_30 = arith.constant 0 : index
    %c0_31 = arith.constant 0 : index
    %97 = vector.load %arg3[%c0_30, %c0_31] : memref<32x128xbf16, #tpu.memory_space<vmem>>, vector<32x128xbf16>
    %cst_32 = arith.constant dense<0.000000e+00> : vector<16x128xf32>
    %98 = tpu.matmul %96, %97, %cst_32 {dimension_numbers = #tpu.dot_dimension_numbers<[1], [0], [0], [1], [0, 0, 1, 1], [], []>} : vector<16x32xbf16>, vector<32x128xbf16>, vector<16x128xf32> -> vector<16x128xf32>
    %c0_33 = arith.constant 0 : index
    %c0_34 = arith.constant 0 : index
    %99 = vector.load %arg7[%c0_33, %c0_34] : memref<1x128xf32, #tpu.memory_space<vmem>>, vector<1x128xf32>
    %100 = vector.broadcast %99 : vector<1x128xf32> to vector<16x128xf32>
    %101 = arith.addf %98, %100 : vector<16x128xf32>
    %cst_35 = arith.constant 5.000000e-01 : f32
    %102 = vector.broadcast %cst_35 : f32 to vector<16x128xf32>
    %103 = arith.mulf %102, %101 : vector<16x128xf32>
    %cst_36 = arith.constant 4.471500e-02 : f32
    %104 = vector.broadcast %cst_36 : f32 to vector<16x128xf32>
    %105 = arith.mulf %104, %101 : vector<16x128xf32>
    %106 = arith.mulf %105, %101 : vector<16x128xf32>
    %107 = arith.mulf %106, %101 : vector<16x128xf32>
    %108 = arith.addf %101, %107 : vector<16x128xf32>
    %cst_37 = arith.constant 0.797884583 : f32
    %109 = vector.broadcast %cst_37 : f32 to vector<16x128xf32>
    %110 = arith.mulf %109, %108 : vector<16x128xf32>
    %111 = math.tanh %110 : vector<16x128xf32>
    %cst_38 = arith.constant 1.000000e+00 : f32
    %112 = vector.broadcast %cst_38 : f32 to vector<16x128xf32>
    %113 = arith.addf %112, %111 : vector<16x128xf32>
    %114 = arith.mulf %103, %113 : vector<16x128xf32>
    %115 = arith.truncf %114 : vector<16x128xf32> to vector<16x128xbf16>
    %c0_39 = arith.constant 0 : index
    %c0_40 = arith.constant 0 : index
    %116 = vector.load %arg4[%c0_39, %c0_40] : memref<128x32xbf16, #tpu.memory_space<vmem>>, vector<128x32xbf16>
    %cst_41 = arith.constant dense<0.000000e+00> : vector<16x32xf32>
    %117 = tpu.matmul %115, %116, %cst_41 {dimension_numbers = #tpu.dot_dimension_numbers<[1], [0], [0], [1], [0, 0, 1, 1], [], []>} : vector<16x128xbf16>, vector<128x32xbf16>, vector<16x32xf32> -> vector<16x32xf32>
    %118 = vector.broadcast %7 : vector<1x32xf32> to vector<16x32xf32>
    %119 = arith.addf %117, %118 : vector<16x32xf32>
    %120 = arith.addf %73, %119 : vector<16x32xf32>
    %c0_42 = arith.constant 0 : index
    %c0_43 = arith.constant 0 : index
    %121 = vector.load %arg9[%c0_42, %c0_43] : memref<16x32xf32, #tpu.memory_space<vmem>>, vector<16x32xf32>
    tpu.vector_store %arg9[%c0_42, %c0_43], %120 {strides = array<i32>} : memref<16x32xf32, #tpu.memory_space<vmem>>, vector<16x32xf32>,
    return
  }
}

</mosaic_0001>

<bundles_post_ra>
// kernel: custom_gpt2_block.1
= control target key start
LH: loop header
LB: loop body
LE: loop exit
PB: predicated region body
PF: predicated region fallthrough
CT: control target
= control target key end

     0   :  { %vm39_vm0 = vcmask 261120   ;;  %s2799_s0 = inlined_call_operand.vmem [shape: f32[16,32], index: 0, kind: input, shape index: {}]   ;;  %s2800_s1 = inlined_call_operand.vmem [shape: bf16[32,96], index: 1, kind: input, shape index: {}]   ;;  %s2801_s2 = inlined_call_operand.vmem [shape: bf16[4,8,32], index: 2, kind: input, shape index: {}]   ;;  %s2802_s3 = inlined_call_operand.vmem [shape: bf16[32,128], index: 3, kind: input, shape index: {}]   ;;  %s2803_s4 = inlined_call_operand.vmem [shape: bf16[128,32], index: 4, kind: input, shape index: {}]   ;;  %s2804_s5 = inlined_call_operand.vmem [shape: f32[16,16], index: 5, kind: input, shape index: {}]   ;;  %s2805_s6 = inlined_call_operand.vmem [shape: f32[1,96], index: 6, kind: input, shape index: {}]   ;;  %s2806_s7 = inlined_call_operand.vmem [shape: f32[1,128], index: 7, kind: input, shape index: {}]   ;;  %s2807_s8 = inlined_call_operand.vmem [shape: f32[8,32], index: 8, kind: input, shape index: {}]   ;;  %s2808_s9 = inlined_call_operand.hbm [shape: f32[16,32], index: 9, kind: output, shape index: {0}]   ;;  %s2809_s10 = inlined_call_operand.vmem [shape: f32[16,64], index: 10, kind: output, shape index: {1}]  }
   0x1   :  { %v36_v0 = vld [vmem:[%s2799_s0] sm:$0xff]  ;;  %v37_v1 = vld [vmem:[%s2799_s0 + $0x8] sm:$0xff] }
   0x2   :  { %v40_v2 = vsel %vm39_vm0, %v36_v0, 0.0  ;;  %v43_v3 = vsel %vm39_vm0, %v37_v1, 0.0 }
   0x3   :  { %41 = vadd.xlane.f32.xlu0 %v40_v2 }
   0x7   :  { %44 = vadd.xlane.f32.xlu0 %v43_v3 }
   0x8   :  { %16 = vsyncpa [#allocation3], 0  ;;  %v2182_v14 = vld [vmem:[%s2800_s1] sm:$0xff]   ;;  %v2265_v15 = vmov 0.0   ;;  %v2183_v16 = vld [vmem:[%s2800_s1 + $0x8] sm:$0xff]   ;;  %vm2266_vm1 = vmmov 0   ;;  %v67_v21 = vlaneseq }
   0x9   :  { %2062 = vmatprep.subr.bf16.mxu1 %v2265_v15  ;;  %2088 = vmatprep.subr.bf16.mxu0 %v2265_v15  ;;  %v38_v26 = vld [vmem:[%s2807_s8] sm:$0xff]  ;;  %s2267_s24 = smov 112   ;;  %s2268_s25 = smov 120   ;;  %vm155_vm2 = vcmask 523264   ;;  %v2271_v54 = vmov 1983009808  }
   0xa   :  { %2063 = vmatpush3.bf16.msra.mxu1 %v2182_v14  ;;  %2066 = vmatprep.mubr.msk.bf16.mxu1 %vm2266_vm1, %v2265_v15  ;;  %v2356_v24 = vshrl.u32 %v67_v21, 7  ;;  %v1983_v39 = vld [vmem:[%s2805_s6] ss:$0 sm:$0xff]  ;;  %s2269_s26 = smov 104   ;;  %s2270_s6 = smov 96   ;;  %v179_v55 = vunpack.c.l.s4 %v2271_v54  ;;  %vm1044_vm3 = vcmask 64512  }
   0xb   :  { %2064 = vmatprep.subr.bf16.mxu1 %v2265_v15  ;;  %2090 = vmatprep.mubr.msk.bf16.mxu0 %vm2266_vm1, %v2265_v15  ;;  %v2272_v57 = vmov 1934713408   ;;  %vm1233_vm4 = vcmask 130048   ;;  %vm1517_vm5 = vcmask 1043456  }
   0xc   :  { %v69_v25 = vsub.s32 0, %v2356_v24  ;;  %v75_v30 = vsub.s32 1, %v2356_v24  ;;  %v180_v56 = vunpack.c.0.s8 %v179_v55  ;;  %v211_v58 = vunpack.c.l.s4 %v2272_v57 }
   0xe   :  { %2065 = vmatpush3.bf16.msra.mxu1 %v2183_v16  ;;  %v70_v29 = vrot.slane %v38_v26, %v69_v25  ;;  %v76_v34 = vrot.slane %v38_v26, %v75_v30  ;;  %v2416_v61 = vsub.s32 %v180_v56, %v2356_v24 }
   0xf   :  { %2070 = vmatprep.subr.bf16.mxu1 %v2265_v15 }
  0x90   :  { %v42_v4 = vpop.xlane.xlu0 %41 }
  0x91   :  { %v47_v5 = vmul.f32 0.03125, %v42_v4 }
  0x93   :  { %v49_v6 = vsub.f32 %v36_v0, %v47_v5  ;;  %v212_v0 = vunpack.c.0.s8 %v211_v58 }
  0x94   :  { %v45_v7 = vpop.xlane.xlu0 %44 }
  0x95   :  { %v48_v8 = vmul.f32 0.03125, %v45_v7  ;;  %v51_v9 = vmul.f32 %v49_v6, %v49_v6 }
  0x97   :  { %v50_v10 = vsub.f32 %v37_v1, %v48_v8  ;;  %v53_v11 = vsel %vm39_vm0, %v51_v9, 0.0 }
  0x98   :  { %54 = vadd.xlane.f32.xlu1 %v53_v11 }
  0x99   :  { %v52_v12 = vmul.f32 %v50_v10, %v50_v10 }
  0x9b   :  { %v56_v13 = vsel %vm39_vm0, %v52_v12, 0.0 }
  0x9c   :  { %57 = vadd.xlane.f32.xlu1 %v56_v13 }
 0x125   :  { %v55_v17 = vpop.xlane.xlu1 %54 }
 0x126   :  { %v59_v18 = vmul.f32 0.03125, %v55_v17 }
 0x128   :  { %v61_v19 = vadd.f32 1e-05, %v59_v18 }
 0x129   :  { %v58_v20 = vpop.xlane.xlu1 %57 }
 0x12a   :  { %2194 = vrsqrt.f32 %v61_v19  ;;  %v60_v22 = vmul.f32 0.03125, %v58_v20 }
 0x12c   :  { %v62_v23 = vadd.f32 1e-05, %v60_v22 }
 0x12e   :  { %2196 = vrsqrt.f32 %v62_v23 }
 0x134   :  { %v2195_v27 = vpop.eup %2194 }
 0x135   :  { %v65_v28 = vmul.f32 %v2195_v27, %v49_v6  ;;  %v2429_v6 = vsub.s32 %v212_v0, %v2356_v24 }
 0x137   :  { %v71_v33 = vmul.f32 %v70_v29, %v65_v28 }
 0x138   :  { %v2197_v31 = vpop.eup %2196 }
 0x139   :  { %v66_v32 = vmul.f32 %v2197_v31, %v50_v10  ;;  %v77_v36 = vadd.f32 %v76_v34, %v71_v33 }
 0x13b   :  { %v72_v35 = vmul.f32 %v70_v29, %v66_v32 }
 0x13d   :  { %v78_v37 = vadd.f32 %v76_v34, %v72_v35 }
 0x13f   :  { %v79_v38 = vpack.c.bf16 %v78_v37, %v77_v36 }
 0x141   :  { %2067 = vmatmul.mubr.msk.bf16.vlgmr.msra.gmra.mrb[0].mxu1 %vm39_vm0, %v79_v38 }
 0x142   :  { %2072 = vmatprep.mubr.msk.bf16.mxu1 %vm2266_vm1, %v2265_v15 }
 0x214   :  { %v140_v40 = vpop.f32.mrb[0].mxu1 }
 0x215   :  { %v2369_v41 = vadd.f32 %v1983_v39, %v140_v40  ;;  %v2068_v42 = vpop.f32.mrb[1].mxu1 }
 0x216   :  { %v143_v43 = vpop.f32.mrb[2].mxu1 }
 0x217   :  { %164 = vrot.lane.b32.xlu1 %v2369_v41, %s2267_s24  ;;  %158 = vrot.lane.b32.xlu0 %v2369_v41, %s2268_s25  ;;  %v2069_v44 = vpop.f32.mrb[3].mxu1  ;;  %v2373_v45 = vadd.f32 %v1983_v39, %v143_v43 }
 0x21b   :  { %170 = vrot.lane.b32.xlu0 %v2369_v41, %s2269_s26  ;;  %160 = vrot.lane.b32.xlu1 %v2373_v45, %s2268_s25 }
 0x21f   :  { %149 = vrot.lane.b32.xlu0 %v2369_v41, %s2270_s6  ;;  %166 = vrot.lane.b32.xlu1 %v2373_v45, %s2267_s24 }
 0x223   :  { %172 = vrot.lane.b32.xlu1 %v2373_v45, %s2269_s26 }
 0x227   :  { %151 = vrot.lane.b32.xlu1 %v2373_v45, %s2270_s6 }
 0x289   :  { %v2381_v46 = vpop.permute.xlu1 %164  ;;  %v2383_v47 = vpop.permute.xlu0 %158 }
 0x28a   :  { %448 = vrot.lane.b32.xlu0 %v2383_v47, %s2270_s6  ;;  %v176_v62 = vcombine.low %v2369_v41, %v2381_v46  ;;  %v177_v63 = vcombine.high %v2369_v41, %v2381_v46 }
 0x28c   :  { %v184_v3 = vrot.slane %v176_v62, %v2416_v61  ;;  %v191_v4 = vrot.slane %v177_v63, %v2416_v61 }
 0x28d   :  { %v2386_v48 = vpop.permute.xlu0 %170  ;;  %v2388_v49 = vpop.permute.xlu1 %160 }
 0x28e   :  { %452 = vrot.lane.b32.xlu0 %v2381_v46, %s2270_s6  ;;  %450 = vrot.lane.b32.xlu1 %v2388_v49, %s2270_s6  ;;  %v192_v59 = vcombine.low %v2383_v47, %v2386_v48  ;;  %v193_v60 = vcombine.high %v2383_v47, %v2386_v48 }
 0x290   :  { %v200_v1 = vrot.slane %v192_v59, %v2416_v61  ;;  %v207_v2 = vrot.slane %v193_v60, %v2416_v61 }
 0x291   :  { %v2392_v50 = vpop.permute.xlu0 %149  ;;  %v2394_v51 = vpop.permute.xlu1 %166 }
 0x292   :  { %156 = vst.msk [vmem:[%s2809_s10] sm:$0xff] %vm155_vm2, %v2392_v50  ;;  %456 = vrot.lane.b32.xlu0 %v2386_v48, %s2270_s6  ;;  %454 = vrot.lane.b32.xlu1 %v2394_v51, %s2270_s6  ;;  %v208_v7 = vcombine.low %v184_v3, %v200_v1  ;;  %v209_v8 = vcombine.high %v184_v3, %v200_v1 }
 0x293   :  { %v224_v9 = vcombine.low %v191_v4, %v207_v2  ;;  %v225_v10 = vcombine.high %v191_v4, %v207_v2  ;;  %v244_v11 = vcombine.low %v2373_v45, %v2394_v51  ;;  %v245_v13 = vcombine.high %v2373_v45, %v2394_v51 }
 0x294   :  { %v216_v17 = vrot.slane %v208_v7, %v2429_v6  ;;  %v223_v18 = vrot.slane %v209_v8, %v2429_v6 }
 0x295   :  { %v2402_v52 = vpop.permute.xlu1 %172  ;;  %v232_v19 = vrot.slane %v224_v9, %v2429_v6  ;;  %v239_v20 = vrot.slane %v225_v10, %v2429_v6  ;;  %v252_v21 = vrot.slane %v244_v11, %v2416_v61  ;;  %v259_v23 = vrot.slane %v245_v13, %v2416_v61 }
 0x296   :  { %458 = vrot.lane.b32.xlu1 %v2402_v52, %s2270_s6  ;;  %v260_v5 = vcombine.low %v2388_v49, %v2402_v52  ;;  %v261_v12 = vcombine.high %v2388_v49, %v2402_v52  ;;  %v312_v29 = vcombine.low %v216_v17, %v223_v18  ;;  %v1987_v30 = vcombine.high %v216_v17, %v223_v18 }
 0x297   :  { %v328_v31 = vcombine.low %v232_v19, %v239_v20  ;;  %v1988_v32 = vcombine.high %v232_v19, %v239_v20 }
 0x298   :  { %v268_v14 = vrot.slane %v260_v5, %v2416_v61  ;;  %v275_v22 = vrot.slane %v261_v12, %v2416_v61  ;;  %v2452_v40 = vrot.slane %v312_v29, %v2416_v61  ;;  %v2455_v42 = vrot.slane %v1987_v30, %v2416_v61 }
 0x299   :  { %v2405_v53 = vpop.permute.xlu1 %151  ;;  %v2458_v55 = vrot.slane %v328_v31, %v2416_v61 }
 0x29a   :  { %157 = vst.msk [vmem:[%s2809_s10 + $0x8] sm:$0xff] %vm155_vm2, %v2405_v53  ;;  %v276_v25 = vcombine.low %v252_v21, %v268_v14  ;;  %v277_v26 = vcombine.high %v252_v21, %v268_v14  ;;  %v292_v33 = vcombine.low %v259_v23, %v275_v22  ;;  %v293_v34 = vcombine.high %v259_v23, %v275_v22 }
 0x29c   :  { %v2448_v37 = vrot.slane %v276_v25, %v2429_v6  ;;  %v291_v38 = vrot.slane %v277_v26, %v2429_v6  ;;  %v300_v56 = vrot.slane %v292_v33, %v2429_v6  ;;  %v307_v57 = vrot.slane %v293_v34, %v2429_v6 }
 0x29e   :  { %v380_v63 = vcombine.low %v2448_v37, %v291_v38  ;;  %v1989_v0 = vcombine.high %v2448_v37, %v291_v38  ;;  %v396_v9 = vcombine.low %v300_v56, %v307_v57  ;;  %v1990_v10 = vcombine.high %v300_v56, %v307_v57 }
 0x2fc   :  { %v449_v16 = vpop.permute.xlu0 %448 }
 0x300   :  { %v453_v27 = vpop.permute.xlu0 %452  ;;  %v451_v28 = vpop.permute.xlu1 %450 }
 0x301   :  { %v466_v35 = vcombine.low %v2392_v50, %v453_v27  ;;  %v467_v36 = vcombine.high %v2392_v50, %v453_v27  ;;  %v2461_v50 = vrot.slane %v1988_v32, %v2416_v61 }
 0x303   :  { %v474_v58 = vrot.slane %v466_v35, %v2416_v61  ;;  %v481_v59 = vrot.slane %v467_v36, %v2416_v61 }
 0x304   :  { %v457_v39 = vpop.permute.xlu0 %456  ;;  %v455_v54 = vpop.permute.xlu1 %454 }
 0x305   :  { %v482_v43 = vcombine.low %v449_v16, %v457_v39  ;;  %v483_v44 = vcombine.high %v449_v16, %v457_v39  ;;  %v534_v1 = vcombine.low %v2405_v53, %v455_v54  ;;  %v535_v2 = vcombine.high %v2405_v53, %v455_v54 }
 0x307   :  { %v490_v60 = vrot.slane %v482_v43, %v2416_v61  ;;  %v497_v62 = vrot.slane %v483_v44, %v2416_v61  ;;  %v542_v18 = vrot.slane %v534_v1, %v2416_v61  ;;  %v549_v53 = vrot.slane %v535_v2, %v2416_v61 }
 0x308   :  { %v459_v8 = vpop.permute.xlu1 %458  ;;  %v411_v1 = vrot.slane %v1990_v10, %v2416_v61 }
 0x309   :  { %v498_v3 = vcombine.low %v474_v58, %v490_v60  ;;  %v499_v4 = vcombine.high %v474_v58, %v490_v60  ;;  %v514_v5 = vcombine.low %v481_v59, %v497_v62  ;;  %v515_v7 = vcombine.high %v481_v59, %v497_v62 }
 0x30a   :  { %v550_v11 = vcombine.low %v451_v28, %v459_v8  ;;  %v551_v12 = vcombine.high %v451_v28, %v459_v8  ;;  %v387_v59 = vrot.slane %v380_v63, %v2416_v61  ;;  %v395_v60 = vrot.slane %v1989_v0, %v2416_v61 }
 0x30b   :  { %v506_v13 = vrot.slane %v498_v3, %v2429_v6  ;;  %v513_v14 = vrot.slane %v499_v4, %v2429_v6  ;;  %v522_v16 = vrot.slane %v514_v5, %v2429_v6  ;;  %v529_v17 = vrot.slane %v515_v7, %v2429_v6 }
 0x30c   :  { %v558_v19 = vrot.slane %v550_v11, %v2416_v61  ;;  %v565_v20 = vrot.slane %v551_v12, %v2416_v61  ;;  %v403_v62 = vrot.slane %v396_v9, %v2416_v61 }
 0x30d   :  { %v602_v21 = vcombine.low %v506_v13, %v513_v14  ;;  %v1991_v22 = vcombine.high %v506_v13, %v513_v14  ;;  %v618_v23 = vcombine.low %v522_v16, %v529_v17  ;;  %v1992_v25 = vcombine.high %v522_v16, %v529_v17 }
 0x30e   :  { %v566_v26 = vcombine.low %v542_v18, %v558_v19  ;;  %v567_v27 = vcombine.high %v542_v18, %v558_v19  ;;  %v582_v28 = vcombine.low %v549_v53, %v565_v20  ;;  %v583_v29 = vcombine.high %v549_v53, %v565_v20 }
 0x30f   :  { %v609_v30 = vrot.slane %v602_v21, %v2416_v61  ;;  %v617_v31 = vrot.slane %v1991_v22, %v2416_v61  ;;  %v625_v32 = vrot.slane %v618_v23, %v2416_v61  ;;  %v633_v33 = vrot.slane %v1992_v25, %v2416_v61 }
 0x310   :  { %v574_v34 = vrot.slane %v566_v26, %v2429_v6  ;;  %v581_v35 = vrot.slane %v567_v27, %v2429_v6  ;;  %v590_v36 = vrot.slane %v582_v28, %v2429_v6  ;;  %v597_v37 = vrot.slane %v583_v29, %v2429_v6 }
 0x311   :  { %v634_v38 = vcombine.low %v609_v30, %v617_v31  ;;  %v650_v39 = vcombine.low %v625_v32, %v633_v33  ;;  %v635_v43 = vcombine.high %v609_v30, %v617_v31  ;;  %v651_v44 = vcombine.high %v625_v32, %v633_v33 }
 0x312   :  { %v670_v54 = vcombine.low %v574_v34, %v581_v35  ;;  %v1993_v56 = vcombine.high %v574_v34, %v581_v35  ;;  %v686_v57 = vcombine.low %v590_v36, %v597_v37  ;;  %v1994_v58 = vcombine.high %v590_v36, %v597_v37 }
 0x313   :  { %v642_v7 = vrot.slane %v634_v38, %v2429_v6  ;;  %v658_v8 = vrot.slane %v650_v39, %v2429_v6  ;;  %v649_v63 = vrot.slane %v635_v43, %v2429_v6  ;;  %v665_v0 = vrot.slane %v651_v44, %v2429_v6 }
 0x314   :  { %v677_v2 = vrot.slane %v670_v54, %v2416_v61  ;;  %v685_v3 = vrot.slane %v1993_v56, %v2416_v61  ;;  %v693_v4 = vrot.slane %v686_v57, %v2416_v61  ;;  %v701_v5 = vrot.slane %v1994_v58, %v2416_v61 }
 0x315   :  { %v412_v13 = vcombine.low %v387_v59, %v395_v60  ;;  %v428_v14 = vcombine.low %v403_v62, %v411_v1  ;;  %v413_v16 = vcombine.high %v387_v59, %v395_v60  ;;  %v429_v17 = vcombine.high %v403_v62, %v411_v1 }
 0x316   :  { %v702_v11 = vcombine.low %v677_v2, %v685_v3  ;;  %v718_v9 = vcombine.low %v693_v4, %v701_v5  ;;  %v703_v12 = vcombine.high %v677_v2, %v685_v3  ;;  %v719_v10 = vcombine.high %v693_v4, %v701_v5 }
 0x317   :  { %v344_v21 = vcombine.low %v2452_v40, %v2455_v42  ;;  %v360_v22 = vcombine.low %v2458_v55, %v2461_v50  ;;  %v345_v23 = vcombine.high %v2452_v40, %v2455_v42  ;;  %v361_v25 = vcombine.high %v2458_v55, %v2461_v50 }
 0x318   :  { %v710_v18 = vrot.slane %v702_v11, %v2429_v6  ;;  %v726_v53 = vrot.slane %v718_v9, %v2429_v6  ;;  %v717_v19 = vrot.slane %v703_v12, %v2429_v6  ;;  %v733_v20 = vrot.slane %v719_v10, %v2429_v6  ;;  %v1043_v10 = vld [vmem:[%s2804_s5 + $0x8] sm:$0xff] }
 0x319   :  { %v666_v26 = vcombine.low %v642_v7, %v658_v8  ;;  %v669_v28 = vcombine.high %v649_v63, %v665_v0  ;;  %v420_v30 = vrot.slane %v412_v13, %v2429_v6  ;;  %v436_v31 = vrot.slane %v428_v14, %v2429_v6 }
 0x31a   :  { %v734_v27 = vcombine.low %v710_v18, %v726_v53  ;;  %v737_v29 = vcombine.high %v717_v19, %v733_v20  ;;  %v427_v34 = vrot.slane %v413_v16, %v2429_v6  ;;  %v443_v35 = vrot.slane %v429_v17, %v2429_v6 }
 0x31b   :  { %v352_v40 = vrot.slane %v344_v21, %v2429_v6  ;;  %v368_v42 = vrot.slane %v360_v22, %v2429_v6  ;;  %v359_v55 = vrot.slane %v345_v23, %v2429_v6  ;;  %v375_v37 = vrot.slane %v361_v25, %v2429_v6 }
 0x31c   :  { %v1038_v32 = vpack.c.bf16 %v734_v27, %v666_v26  ;;  %v1041_v33 = vpack.c.bf16 %v737_v29, %v669_v28  ;;  %v735_v38 = vcombine.high %v710_v18, %v726_v53  ;;  %v444_v39 = vcombine.low %v420_v30, %v436_v31 }
 0x31d   :  { %v447_v43 = vcombine.high %v427_v34, %v443_v35  ;;  %v667_v44 = vcombine.high %v642_v7, %v658_v8  ;;  %v376_v54 = vcombine.low %v352_v40, %v368_v42  ;;  %v379_v56 = vcombine.high %v359_v55, %v375_v37 }
 0x31e   :  { %v1049_v50 = vsel %vm1044_vm3, %v1038_v32, 0  ;;  %v1190_v36 = vsel %vm1044_vm3, %v1041_v33, 0  ;;  %v736_v62 = vcombine.low %v717_v19, %v733_v20  ;;  %v445_v1 = vcombine.high %v420_v30, %v436_v31 }
 0x31f   :  { %2071 = vmatpush3.bf16.xpose.msra.mxu1 %v1049_v50  ;;  %2089 = vmatpush3.bf16.xpose.msra.mxu0 %v1190_v36  ;;  %v1039_v57 = vpack.c.bf16 %v735_v38, %v667_v44  ;;  %v1034_v58 = vpack.c.bf16 %v444_v39, %v376_v54  ;;  %v1037_v59 = vpack.c.bf16 %v447_v43, %v379_v56 }
 0x320   :  { %2076 = vmatprep.subr.bf16.mxu1 %v2265_v15  ;;  %2100 = vmatprep.subr.bf16.mxu0 %v2265_v15  ;;  %v668_v2 = vcombine.low %v649_v63, %v665_v0  ;;  %v377_v3 = vcombine.high %v352_v40, %v368_v42  ;;  %v446_v8 = vcombine.low %v427_v34, %v443_v35  ;;  %v1042_v63 = vld [vmem:[%s2804_s5] sm:$0xff]  ;;  %s2273_s5 = smov 64  }
 0x321   :  { %v1096_v60 = vsel %vm1044_vm3, %v1039_v57, 0  ;;  %v378_v11 = vcombine.low %v359_v55, %v375_v37 }
 0x322   :  { %v1040_v4 = vpack.c.bf16 %v736_v62, %v668_v2  ;;  %v1035_v5 = vpack.c.bf16 %v445_v1, %v377_v3 }
 0x323   :  { %v1036_v9 = vpack.c.bf16 %v446_v8, %v378_v11 }
 0x324   :  { %v1143_v7 = vsel %vm1044_vm3, %v1040_v4, 0 }
 0x326   :  { %2073 = vmatmul.mubr.msk.bf16.vlgmr.msra.gmra.mrb[4].mxu1 %vm1044_vm3, %v1034_v58  ;;  %2091 = vmatmul.mubr.msk.bf16.vlgmr.msra.gmra.mrb[0].mxu0 %vm1044_vm3, %v1037_v59 }
 0x327   :  { %2077 = vmatpush3.bf16.xpose.msra.mxu1 %v1096_v60  ;;  %2078 = vmatprep.mubr.msk.bf16.mxu1 %vm2266_vm1, %v2265_v15 }
 0x328   :  { %2082 = vmatprep.subr.bf16.mxu1 %v2265_v15  ;;  %2102 = vmatprep.mubr.msk.bf16.mxu0 %vm2266_vm1, %v2265_v15 }
 0x32e   :  { %2079 = vmatmul.mubr.msk.bf16.vlgmr.msra.gmra.mrb[8].mxu1 %vm1044_vm3, %v1035_v5 }
 0x32f   :  { %2083 = vmatpush3.bf16.xpose.msra.mxu1 %v1143_v7  ;;  %2084 = vmatprep.mubr.msk.bf16.mxu1 %vm2266_vm1, %v2265_v15 }
 0x330   :  { %2094 = vmatprep.subr.bf16.mxu1 %v2265_v15 }
 0x336   :  { %2085 = vmatmul.mubr.msk.bf16.vlgmr.msra.gmra.mrb[12].mxu1 %vm1044_vm3, %v1036_v9 }
 0x337   :  { %2096 = vmatprep.mubr.msk.bf16.mxu1 %vm2266_vm1, %v2265_v15 }
 0x3f9   :  { %v1085_v0 = vpop.f32.mrb[4].mxu1  ;;  %v1226_v12 = vpop.f32.mrb[0].mxu0 }
 0x3fa   :  { %v1086_v13 = vadd.f32 %v1085_v0, %v1042_v63  ;;  %v2074_v14 = vpop.f32.mrb[5].mxu1  ;;  %v2092_v16 = vpop.f32.mrb[1].mxu0  ;;  %v1227_v55 = vadd.f32 %v1226_v12, %v1042_v63 }
 0x3fb   :  { %v1088_v17 = vpop.f32.mrb[6].mxu1  ;;  %v1229_v18 = vpop.f32.mrb[2].mxu0 }
 0x3fc   :  { %v1089_v53 = vadd.f32 %v1088_v17, %v1043_v10  ;;  %v2075_v19 = vpop.f32.mrb[7].mxu1  ;;  %v2093_v20 = vpop.f32.mrb[3].mxu0  ;;  %v1234_v21 = vsel %vm1233_vm4, %v1086_v13, -inf  ;;  %v2548_v22 = vadd.f32 %v1229_v18, %v1043_v10  ;;  %v1252_v38 = vsel %vm1233_vm4, %v1227_v55, -inf }
 0x3fd   :  { %1235 = vmax.xlane.f32.xlu0 %v1234_v21 }
 0x3fe   :  { %v1237_v23 = vsel %vm1233_vm4, %v1089_v53, -inf  ;;  %v1255_v28 = vsel %vm1233_vm4, %v2548_v22, -inf }
 0x3ff   :  { %1238 = vmax.xlane.f32.xlu1 %v1237_v23 }
 0x401   :  { %v1132_v25 = vpop.f32.mrb[8].mxu1 }
 0x402   :  { %v1133_v26 = vadd.f32 %v1132_v25, %v1042_v63  ;;  %v2080_v27 = vpop.f32.mrb[9].mxu1 }
 0x403   :  { %1256 = vmax.xlane.f32.xlu1 %v1255_v28  ;;  %v1135_v29 = vpop.f32.mrb[10].mxu1 }
 0x404   :  { %v1136_v30 = vadd.f32 %v1135_v29, %v1043_v10  ;;  %v2081_v31 = vpop.f32.mrb[11].mxu1  ;;  %v1240_v32 = vsel %vm1233_vm4, %v1133_v26, -inf }
 0x405   :  { %1241 = vmax.xlane.f32.xlu0 %v1240_v32 }
 0x406   :  { %v1243_v33 = vsel %vm1233_vm4, %v1136_v30, -inf }
 0x409   :  { %1244 = vmax.xlane.f32.xlu0 %v1243_v33  ;;  %v1179_v34 = vpop.f32.mrb[12].mxu1 }
 0x40a   :  { %v1180_v35 = vadd.f32 %v1179_v34, %v1042_v63  ;;  %v2086_v40 = vpop.f32.mrb[13].mxu1 }
 0x40b   :  { %v1182_v42 = vpop.f32.mrb[14].mxu1 }
 0x40c   :  { %v2555_v50 = vadd.f32 %v1182_v42, %v1043_v10  ;;  %v2087_v36 = vpop.f32.mrb[15].mxu1  ;;  %v1246_v37 = vsel %vm1233_vm4, %v1180_v35, -inf }
 0x40d   :  { %1247 = vmax.xlane.f32.xlu0 %v1246_v37 }
 0x40e   :  { %v1249_v39 = vsel %vm1233_vm4, %v2555_v50, -inf }
 0x411   :  { %1253 = vmax.xlane.f32.xlu0 %v1252_v38 }
 0x414   :  { %740 = vrot.lane.b32.xlu1 %v2373_v45, %s2273_s5 }
 0x418   :  { %742 = vrot.lane.b32.xlu1 %v2383_v47, %s2273_s5 }
 0x41c   :  { %744 = vrot.lane.b32.xlu1 %v2388_v49, %s2273_s5 }
 0x427   :  { %738 = vrot.lane.b32.xlu0 %v2369_v41, %s2273_s5 }
 0x42b   :  { %746 = vrot.lane.b32.xlu0 %v2381_v46, %s2273_s5 }
 0x42f   :  { %750 = vrot.lane.b32.xlu0 %v2386_v48, %s2273_s5 }
 0x440   :  { %1250 = vmax.xlane.f32.xlu1 %v1249_v39 }
 0x451   :  { %748 = vrot.lane.b32.xlu1 %v2394_v51, %s2273_s5 }
 0x48a   :  { %v1236_v45 = vpop.xlane.xlu0 %1235 }
 0x48b   :  { %v1258_v47 = vsub.f32 %v1086_v13, %v1236_v45 }
 0x48c   :  { %v1239_v43 = vpop.xlane.xlu1 %1238 }
 0x48d   :  { %v1266_v49 = vmul.f32 1.442695, %v1258_v47  ;;  %v1259_v44 = vsub.f32 %v1089_v53, %v1239_v43 }
 0x48f   :  { %2198 = vpow2.f32 %v1266_v49  ;;  %v1268_v41 = vmul.f32 1.442695, %v1259_v44 }
 0x490   :  { %v1257_v60 = vpop.xlane.xlu1 %1256 }
 0x491   :  { %2200 = vpow2.f32 %v1268_v41  ;;  %v1265_v4 = vsub.f32 %v2548_v22, %v1257_v60 }
 0x492   :  { %v1242_v54 = vpop.xlane.xlu0 %1241 }
 0x493   :  { %v1260_v46 = vsub.f32 %v1133_v26, %v1242_v54  ;;  %v1280_v9 = vmul.f32 1.442695, %v1265_v4 }
 0x494   :  { %v741_v19 = vpop.permute.xlu1 %740 }
 0x495   :  { %v1270_v56 = vmul.f32 1.442695, %v1260_v46 }
 0x496   :  { %v1245_v57 = vpop.xlane.xlu0 %1244 }
 0x497   :  { %2202 = vpow2.f32 %v1270_v56  ;;  %v1261_v48 = vsub.f32 %v1136_v30, %v1245_v57 }
 0x498   :  { %v743_v20 = vpop.permute.xlu1 %742 }
 0x499   :  { %v2575_v58 = vpop.eup %2198  ;;  %v1272_v59 = vmul.f32 1.442695, %v1261_v48 }
 0x49a   :  { %v1248_v62 = vpop.xlane.xlu0 %1247  ;;  %v1282_v51 = vsel %vm1233_vm4, %v2575_v58, 0.0 }
 0x49b   :  { %v2579_v1 = vpop.eup %2200  ;;  %2204 = vpow2.f32 %v1272_v59  ;;  %v1262_v2 = vsub.f32 %v1180_v35, %v1248_v62  ;;  %1283 = vadd.xlane.f32.xlu0 %v1282_v51 }
 0x49c   :  { %v1285_v3 = vsel %vm1233_vm4, %v2579_v1, 0.0  ;;  %v745_v21 = vpop.permute.xlu1 %744 }
 0x49d   :  { %v1274_v5 = vmul.f32 1.442695, %v1262_v2  ;;  %1286 = vadd.xlane.f32.xlu1 %v1285_v3 }
 0x49e   :  { %v1254_v7 = vpop.xlane.xlu0 %1253 }
 0x49f   :  { %2206 = vpow2.f32 %v1274_v5  ;;  %v1264_v8 = vsub.f32 %v1227_v55, %v1254_v7 }
 0x4a1   :  { %v2584_v11 = vpop.eup %2202  ;;  %v1278_v63 = vmul.f32 1.442695, %v1264_v8 }
 0x4a2   :  { %v1288_v0 = vsel %vm1233_vm4, %v2584_v11, 0.0  ;;  %v739_v28 = vpop.permute.xlu0 %738 }
 0x4a3   :  { %2208 = vpow2.f32 %v1278_v63  ;;  %1289 = vadd.xlane.f32.xlu0 %v1288_v0 }
 0x4a4   :  { %2210 = vpow2.f32 %v1280_v9 }
 0x4a5   :  { %v2588_v12 = vpop.eup %2204 }
 0x4a6   :  { %v1291_v10 = vsel %vm1233_vm4, %v2588_v12, 0.0  ;;  %v747_v29 = vpop.permute.xlu0 %746 }
 0x4a7   :  { %1292 = vadd.xlane.f32.xlu1 %v1291_v10  ;;  %v762_v32 = vcombine.low %v739_v28, %v747_v29  ;;  %v763_v33 = vcombine.high %v739_v28, %v747_v29 }
 0x4a9   :  { %v2592_v13 = vpop.eup %2206  ;;  %v770_v35 = vrot.slane %v762_v32, %v2416_v61  ;;  %v777_v55 = vrot.slane %v763_v33, %v2416_v61 }
 0x4aa   :  { %v1294_v14 = vsel %vm1233_vm4, %v2592_v13, 0.0  ;;  %v751_v30 = vpop.permute.xlu0 %750 }
 0x4ab   :  { %1295 = vadd.xlane.f32.xlu0 %v1294_v14  ;;  %v778_v31 = vcombine.low %v743_v20, %v751_v30 }
 0x4ad   :  { %v2596_v16 = vpop.eup %2208  ;;  %v786_v34 = vrot.slane %v778_v31, %v2416_v61 }
 0x4ae   :  { %v1300_v17 = vsel %vm1233_vm4, %v2596_v16, 0.0  ;;  %v2600_v18 = vpop.eup %2210 }
 0x4af   :  { %1301 = vadd.xlane.f32.xlu0 %v1300_v17  ;;  %v1303_v53 = vsel %vm1233_vm4, %v2600_v18, 0.0  ;;  %v795_v36 = vcombine.high %v770_v35, %v786_v34 }
 0x4b1   :  { %v809_v43 = vrot.slane %v795_v36, %v2429_v6 }
 0x4b3   :  { %1304 = vadd.xlane.f32.xlu0 %v1303_v53 }
 0x4b8   :  { %752 = vrot.lane.b32.xlu1 %v2402_v52, %s2273_s5  ;;  %v779_v52 = vcombine.high %v743_v20, %v751_v30 }
 0x4ba   :  { %v793_v40 = vrot.slane %v779_v52, %v2416_v61 }
 0x4bc   :  { %v810_v37 = vcombine.low %v777_v55, %v793_v40  ;;  %v811_v38 = vcombine.high %v777_v55, %v793_v40 }
 0x4be   :  { %v818_v49 = vrot.slane %v810_v37, %v2429_v6  ;;  %v825_v44 = vrot.slane %v811_v38, %v2429_v6 }
 0x4c0   :  { %v914_v59 = vcombine.low %v818_v49, %v825_v44  ;;  %v1996_v60 = vcombine.high %v818_v49, %v825_v44 }
 0x4c2   :  { %v921_v0 = vrot.slane %v914_v59, %v2416_v61  ;;  %v929_v10 = vrot.slane %v1996_v60, %v2416_v61 }
 0x4c4   :  { %v946_v28 = vcombine.low %v921_v0, %v929_v10  ;;  %v947_v30 = vcombine.high %v921_v0, %v929_v10 }
 0x4c6   :  { %v954_v37 = vrot.slane %v946_v28, %v2429_v6 }
 0x4cd   :  { %v1251_v22 = vpop.xlane.xlu1 %1250 }
 0x4ce   :  { %v1263_v23 = vsub.f32 %v2555_v50, %v1251_v22  ;;  %v794_v50 = vcombine.low %v770_v35, %v786_v34 }
 0x4d0   :  { %v1276_v25 = vmul.f32 1.442695, %v1263_v23  ;;  %v802_v47 = vrot.slane %v794_v50, %v2429_v6 }
 0x4d1   :  { %v749_v42 = vpop.permute.xlu1 %748 }
 0x4d2   :  { %2212 = vpow2.f32 %v1276_v25  ;;  %v898_v46 = vcombine.low %v802_v47, %v809_v43  ;;  %v1995_v56 = vcombine.high %v802_v47, %v809_v43  ;;  %v830_v57 = vcombine.low %v741_v19, %v749_v42 }
 0x4d3   :  { %v831_v48 = vcombine.high %v741_v19, %v749_v42 }
 0x4d4   :  { %v905_v4 = vrot.slane %v898_v46, %v2416_v61  ;;  %v913_v5 = vrot.slane %v1995_v56, %v2416_v61  ;;  %v838_v7 = vrot.slane %v830_v57, %v2416_v61 }
 0x4d5   :  { %v845_v8 = vrot.slane %v831_v48, %v2416_v61 }
 0x4d6   :  { %v931_v29 = vcombine.high %v905_v4, %v913_v5 }
 0x4d8   :  { %v945_v38 = vrot.slane %v931_v29, %v2429_v6  ;;  %v1513_v29 = vld [vmem:[%s2801_s2 + $0xc] sm:$0xf] }
 0x4dc   :  { %v2607_v26 = vpop.eup %2212 }
 0x4dd   :  { %v1297_v27 = vsel %vm1233_vm4, %v2607_v26, 0.0 }
 0x4de   :  { %1298 = vadd.xlane.f32.xlu1 %v1297_v27 }
 0x528   :  { %v1284_v39 = vpop.xlane.xlu0 %1283 }
 0x529   :  { %2214 = vrcp.f32 %v1284_v39  ;;  %v961_v39 = vrot.slane %v947_v30, %v2429_v6 }
 0x52a   :  { %v1287_v45 = vpop.xlane.xlu1 %1286 }
 0x52b   :  { %2216 = vrcp.f32 %v1287_v45 }
 0x530   :  { %v1290_v41 = vpop.xlane.xlu0 %1289 }
 0x533   :  { %v2215_v36 = vpop.eup %2214 }
 0x534   :  { %v1293_v54 = vpop.xlane.xlu1 %1292  ;;  %v1314_v10 = vmul.f32 %v2215_v36, %v2575_v58 }
 0x535   :  { %2218 = vrcp.f32 %v1293_v54  ;;  %v2217_v45 = vpop.eup %2216 }
 0x536   :  { %2220 = vrcp.f32 %v1290_v41 }
 0x538   :  { %v2619_v62 = vpop.xlane.xlu0 %1295  ;;  %v753_v51 = vpop.permute.xlu1 %752 }
 0x539   :  { %v846_v2 = vcombine.low %v745_v21, %v753_v51  ;;  %v847_v3 = vcombine.high %v745_v21, %v753_v51  ;;  %v930_v21 = vcombine.low %v905_v4, %v913_v5  ;;  %v1315_v4 = vmul.f32 %v2217_v45, %v2579_v1 }
 0x53b   :  { %v854_v9 = vrot.slane %v846_v2, %v2416_v61  ;;  %v861_v63 = vrot.slane %v847_v3, %v2416_v61  ;;  %v938_v35 = vrot.slane %v930_v21, %v2429_v6  ;;  %v964_v2 = vcombine.low %v945_v38, %v961_v39 }
 0x53c   :  { %v1302_v14 = vpop.xlane.xlu0 %1301 }
 0x53d   :  { %v862_v17 = vcombine.low %v838_v7, %v854_v9  ;;  %v863_v53 = vcombine.high %v838_v7, %v854_v9  ;;  %v878_v19 = vcombine.low %v845_v8, %v861_v63  ;;  %v879_v20 = vcombine.high %v845_v8, %v861_v63 }
 0x53e   :  { %v962_v48 = vcombine.low %v938_v35, %v954_v37  ;;  %v963_v59 = vcombine.high %v938_v35, %v954_v37  ;;  %v965_v7 = vcombine.high %v945_v38, %v961_v39 }
 0x53f   :  { %v870_v22 = vrot.slane %v862_v17, %v2429_v6  ;;  %v877_v23 = vrot.slane %v863_v53, %v2429_v6  ;;  %v886_v25 = vrot.slane %v878_v19, %v2429_v6  ;;  %v893_v27 = vrot.slane %v879_v20, %v2429_v6  ;;  %v2219_v41 = vpop.eup %2218 }
 0x540   :  { %v1305_v34 = vpop.xlane.xlu0 %1304  ;;  %v2221_v57 = vpop.eup %2220  ;;  %v1317_v5 = vmul.f32 %v2219_v41, %v2588_v12  ;;  %v1322_v53 = vpack.c.bf16 %v1315_v4, %v1314_v10  ;;  %v1719_v10 = vsub.s32 2, %v2356_v24 }
 0x541   :  { %v966_v31 = vcombine.low %v870_v22, %v877_v23  ;;  %v1997_v32 = vcombine.high %v870_v22, %v877_v23  ;;  %v982_v52 = vcombine.low %v886_v25, %v893_v27  ;;  %v1998_v33 = vcombine.high %v886_v25, %v893_v27 }
 0x542   :  { %2222 = vrcp.f32 %v1305_v34 }
 0x543   :  { %v973_v40 = vrot.slane %v966_v31, %v2416_v61  ;;  %v981_v42 = vrot.slane %v1997_v32, %v2416_v61  ;;  %v989_v55 = vrot.slane %v982_v52, %v2416_v61  ;;  %v997_v50 = vrot.slane %v1998_v33, %v2416_v61  ;;  %v1512_v32 = vld [vmem:[%s2801_s2 + $0x8] sm:$0xf] }
 0x544   :  { %2224 = vrcp.f32 %v1302_v14 }
 0x545   :  { %v998_v47 = vcombine.low %v973_v40, %v981_v42  ;;  %v1014_v43 = vcombine.low %v989_v55, %v997_v50  ;;  %v999_v49 = vcombine.high %v973_v40, %v981_v42  ;;  %v1015_v44 = vcombine.high %v989_v55, %v997_v50 }
 0x546   :  { %2226 = vrcp.f32 %v2619_v62  ;;  %v1511_v62 = vld [vmem:[%s2801_s2 + $0x4] sm:$0xf]  ;;  %v1660_v55 = vsel %vm1517_vm5, %v1513_v29, 0  ;;  %v1613_v50 = vsel %vm1517_vm5, %v1512_v32, 0 }
 0x547   :  { %v1006_v54 = vrot.slane %v998_v47, %v2429_v6  ;;  %v1022_v46 = vrot.slane %v1014_v43, %v2429_v6  ;;  %v1013_v61 = vrot.slane %v999_v49, %v2429_v6  ;;  %v1029_v56 = vrot.slane %v1015_v44, %v2429_v6 }
 0x548   :  { %v1316_v6 = vmul.f32 %v2221_v57, %v2584_v11 }
 0x549   :  { %v1030_v60 = vcombine.low %v1006_v54, %v1022_v46  ;;  %v1031_v51 = vcombine.high %v1006_v54, %v1022_v46  ;;  %v1032_v3 = vcombine.low %v1013_v61, %v1029_v56  ;;  %v1033_v8 = vcombine.high %v1013_v61, %v1029_v56 }
 0x54a   :  { %v1323_v19 = vpack.c.bf16 %v1317_v5, %v1316_v6 }
 0x54b   :  { %v1326_v9 = vpack.c.bf16 %v1030_v60, %v962_v48  ;;  %v1327_v63 = vpack.c.bf16 %v1031_v51, %v963_v59  ;;  %v1328_v0 = vpack.c.bf16 %v1032_v3, %v964_v2  ;;  %v1329_v14 = vpack.c.bf16 %v1033_v8, %v965_v7 }
 0x54c   :  { %v2223_v17 = vpop.eup %2222 }
 0x54d   :  { %2095 = vmatpush3.bf16.msra.mxu1 %v1326_v9  ;;  %2101 = vmatpush3.bf16.msra.mxu0 %v1327_v63  ;;  %v1321_v58 = vmul.f32 %v2223_v17, %v2600_v18 }
 0x54e   :  { %2106 = vmatprep.subr.bf16.mxu1 %v2265_v15  ;;  %2112 = vmatprep.subr.bf16.mxu0 %v2265_v15  ;;  %v2225_v1 = vpop.eup %2224 }
 0x54f   :  { %v1320_v11 = vmul.f32 %v2225_v1, %v2596_v16  ;;  %v1510_v16 = vld [vmem:[%s2801_s2] sm:$0xf] }
 0x550   :  { %2097 = vmatmul.mubr.msk.bf16.vlgmr.msra.gmra.mrb[16].mxu1 %vm1233_vm4, %v1322_v53  ;;  %2103 = vmatmul.mubr.msk.bf16.vlgmr.msra.gmra.mrb[4].mxu0 %vm1233_vm4, %v1323_v19  ;;  %v2227_v20 = vpop.eup %2226  ;;  %v1519_v27 = vsel %vm1517_vm5, %v1510_v16, 0  ;;  %v2711_v19 = vld [vmem:[%s2807_s8] sm:$0xff] }
 0x551   :  { %2107 = vmatpush3.bf16.msra.mxu1 %v1328_v0  ;;  %2113 = vmatpush3.bf16.msra.mxu0 %v1329_v14  ;;  %v1325_v12 = vpack.c.bf16 %v1321_v58, %v1320_v11  ;;  %v1318_v22 = vmul.f32 %v2227_v20, %v2592_v13  ;;  %v1566_v13 = vsel %vm1517_vm5, %v1511_v62, 0  ;;  %v1720_v1 = vrot.slane %v2711_v19, %v1719_v10  ;;  %v2239_v62 = vld [vmem:[%s2799_s0] sm:$0xff] }
 0x552   :  { %2114 = vmatprep.mubr.msk.bf16.mxu0 %vm2266_vm1, %v2265_v15  ;;  %2108 = vmatprep.mubr.msk.bf16.mxu1 %vm2266_vm1, %v2265_v15  ;;  %v2011_v10 = vld [vmem:[%s2806_s7] ss:$0 sm:$0xff] }
 0x553   :  { %2118 = vmatprep.subr.bf16.mxu1 %v2265_v15  ;;  %2124 = vmatprep.subr.bf16.mxu0 %v2265_v15 }
 0x558   :  { %2115 = vmatmul.mubr.msk.bf16.vlgmr.msra.gmra.mrb[8].mxu0 %vm1233_vm4, %v1325_v12 }
 0x559   :  { %2126 = vmatprep.mubr.msk.bf16.mxu0 %vm2266_vm1, %v2265_v15  ;;  %2125 = vmatpush3.bf16.msra.mxu0 %v1566_v13 }
 0x55a   :  { %2136 = vmatprep.subr.bf16.mxu0 %v2265_v15 }
 0x56b   :  { %v1299_v18 = vpop.xlane.xlu1 %1298 }
 0x56c   :  { %2228 = vrcp.f32 %v1299_v18 }
 0x576   :  { %v2229_v21 = vpop.eup %2228 }
 0x577   :  { %v1319_v23 = vmul.f32 %v2229_v21, %v2607_v26 }
 0x579   :  { %v1324_v25 = vpack.c.bf16 %v1319_v23, %v1318_v22 }
 0x57b   :  { %2109 = vmatmul.mubr.msk.bf16.vlgmr.msra.gmra.mrb[20].mxu1 %vm1233_vm4, %v1324_v25 }
 0x57c   :  { %2120 = vmatprep.mubr.msk.bf16.mxu1 %vm2266_vm1, %v2265_v15  ;;  %2119 = vmatpush3.bf16.msra.mxu1 %v1519_v27 }
 0x57d   :  { %2130 = vmatprep.subr.bf16.mxu1 %v2265_v15 }
 0x623   :  { %v1367_v26 = vpop.f32.mrb[16].mxu1  ;;  %v1411_v28 = vpop.f32.mrb[4].mxu0 }
 0x624   :  { %v2098_v30 = vpop.f32.mrb[17].mxu1  ;;  %v2104_v31 = vpop.f32.mrb[5].mxu0 }
 0x625   :  { %v1370_v52 = vpop.f32.mrb[18].mxu1  ;;  %v1414_v33 = vpop.f32.mrb[6].mxu0 }
 0x626   :  { %v1506_v34 = vpack.c.bf16 %v1370_v52, %v1367_v26  ;;  %v1507_v35 = vpack.c.bf16 %v1414_v33, %v1411_v28  ;;  %v2099_v40 = vpop.f32.mrb[19].mxu1  ;;  %v2105_v42 = vpop.f32.mrb[7].mxu0  ;;  %v2240_v26 = vld [vmem:[%s2799_s0 + $0x8] sm:$0xff] }
 0x628   :  { %2121 = vmatmul.mubr.msk.bf16.vlgmr.msra.gmra.mrb[24].mxu1 %vm1044_vm3, %v1506_v34  ;;  %2127 = vmatmul.mubr.msk.bf16.vlgmr.msra.gmra.mrb[12].mxu0 %vm1044_vm3, %v1507_v35 }
 0x629   :  { %2137 = vmatpush3.bf16.msra.mxu0 %v1660_v55  ;;  %2138 = vmatprep.mubr.msk.bf16.mxu0 %vm2266_vm1, %v2265_v15 }
 0x62a   :  { %2131 = vmatpush3.bf16.msra.mxu1 %v1613_v50  ;;  %2132 = vmatprep.mubr.msk.bf16.mxu1 %vm2266_vm1, %v2265_v15  ;;  %v2184_v50 = vld [vmem:[%s2802_s3] sm:$0xff]  }
 0x62b   :  { %v1499_v36 = vpop.f32.mrb[8].mxu0  ;;  %2142 = vmatprep.subr.bf16.mxu1 %v2265_v15  ;;  %2150 = vmatprep.subr.bf16.mxu0 %v2265_v15 }
 0x62c   :  { %v2116_v37 = vpop.f32.mrb[9].mxu0 }
 0x62d   :  { %v1502_v38 = vpop.f32.mrb[10].mxu0 }
 0x62e   :  { %v1509_v39 = vpack.c.bf16 %v1502_v38, %v1499_v36  ;;  %v2117_v45 = vpop.f32.mrb[11].mxu0  ;;  %v2185_v36 = vld [vmem:[%s2802_s3 + $0x8] sm:$0xff]  }
 0x630   :  { %2139 = vmatmul.mubr.msk.bf16.vlgmr.msra.gmra.mrb[16].mxu0 %vm1044_vm3, %v1509_v39 }
 0x631   :  { %2166 = vmatprep.mubr.msk.bf16.mxu0 %vm2266_vm1, %v2265_v15 }
 0x64e   :  { %v1455_v47 = vpop.f32.mrb[20].mxu1 }
 0x64f   :  { %v2110_v43 = vpop.f32.mrb[21].mxu1 }
 0x650   :  { %v1458_v49 = vpop.f32.mrb[22].mxu1 }
 0x651   :  { %v1508_v44 = vpack.c.bf16 %v1458_v49, %v1455_v47  ;;  %v2111_v41 = vpop.f32.mrb[23].mxu1  ;;  %v1753_v49 = vsub.s32 3, %v2356_v24 }
 0x652   :  { %v1759_v41 = vsub.s32 4, %v2356_v24 }
 0x653   :  { %2133 = vmatmul.mubr.msk.bf16.vlgmr.msra.gmra.mrb[28].mxu1 %vm1044_vm3, %v1508_v44  ;;  %v1754_v44 = vrot.slane %v2711_v19, %v1753_v49 }
 0x654   :  { %2146 = vmatprep.mubr.msk.bf16.mxu1 %vm2266_vm1, %v2265_v15  ;;  %2143 = vmatpush3.bf16.msra.mxu1 %v2184_v50 }
 0x655   :  { %2144 = vmatprep.subr.bf16.mxu1 %v2265_v15 }
 0x658   :  { %2145 = vmatpush3.bf16.msra.mxu1 %v2185_v36 }
 0x6fb   :  { %v1555_v54 = vpop.f32.mrb[24].mxu1  ;;  %v1602_v46 = vpop.f32.mrb[12].mxu0 }
 0x6fc   :  { %v1703_v61 = vsel %vm39_vm0, %v1555_v54, 0.0  ;;  %v1704_v56 = vsel %vm39_vm0, %v1602_v46, 0.0  ;;  %v2122_v57 = vpop.f32.mrb[25].mxu1  ;;  %v2128_v48 = vpop.f32.mrb[13].mxu0 }
 0x6fd   :  { %v1705_v59 = vadd.f32 %v1704_v56, %v1703_v61  ;;  %v1558_v60 = vpop.f32.mrb[26].mxu1  ;;  %v1605_v51 = vpop.f32.mrb[14].mxu0  ;;  %v1760_v48 = vrot.slane %v2711_v19, %v1759_v41 }
 0x6fe   :  { %v1710_v2 = vsel %vm39_vm0, %v1558_v60, 0.0  ;;  %v1711_v3 = vsel %vm39_vm0, %v1605_v51, 0.0  ;;  %v2123_v4 = vpop.f32.mrb[27].mxu1  ;;  %v2129_v5 = vpop.f32.mrb[15].mxu0 }
 0x6ff   :  { %v1712_v7 = vadd.f32 %v1711_v3, %v1710_v2  ;;  %v2186_v3 = vld [vmem:[%s2803_s4] sm:$0xff]   ;;  %v2187_v4 = vld [vmem:[%s2803_s4 + $0x8] sm:$0xff]   ;;  %v2188_v5 = vld [vmem:[%s2803_s4 + $0x10] sm:$0xff]  }
 0x700   :  { %2151 = vmatpush3.bf16.msra.mxu0 %v2186_v3 }
 0x701   :  { %2152 = vmatprep.subr.bf16.mxu0 %v2265_v15 }
 0x703   :  { %v1696_v8 = vpop.f32.mrb[16].mxu0 }
 0x704   :  { %v2140_v9 = vpop.f32.mrb[17].mxu0  ;;  %v1708_v11 = vsel %vm39_vm0, %v1696_v8, 0.0  ;;  %2153 = vmatpush3.bf16.msra.mxu0 %v2187_v4  ;;  %v2190_v8 = vld [vmem:[%s2803_s4 + $0x20] sm:$0xff]  }
 0x705   :  { %v1699_v63 = vpop.f32.mrb[18].mxu0  ;;  %2154 = vmatprep.subr.bf16.mxu0 %v2265_v15  ;;  %v2191_v9 = vld [vmem:[%s2803_s4 + $0x28] sm:$0xff]  }
 0x706   :  { %v2141_v0 = vpop.f32.mrb[19].mxu0  ;;  %v1715_v22 = vsel %vm39_vm0, %v1699_v63, 0.0  ;;  %v2192_v63 = vld [vmem:[%s2803_s4 + $0x30] sm:$0xff]  }
 0x707   :  { %v2193_v0 = vld [vmem:[%s2803_s4 + $0x38] sm:$0xff]  }
 0x708   :  { %2155 = vmatpush3.bf16.msra.mxu0 %v2188_v5 }
 0x709   :  { %2156 = vmatprep.subr.bf16.mxu0 %v2265_v15 }
 0x726   :  { %v1649_v6 = vpop.f32.mrb[28].mxu1 }
 0x727   :  { %v1706_v14 = vsel %vm39_vm0, %v1649_v6, 0.0  ;;  %v2134_v17 = vpop.f32.mrb[29].mxu1 }
 0x728   :  { %v1707_v53 = vadd.f32 %v1706_v14, %v1705_v59  ;;  %v1652_v58 = vpop.f32.mrb[30].mxu1 }
 0x729   :  { %v1713_v12 = vsel %vm39_vm0, %v1652_v58, 0.0  ;;  %v2135_v18 = vpop.f32.mrb[31].mxu1 }
 0x72a   :  { %v1709_v20 = vadd.f32 %v1708_v11, %v1707_v53  ;;  %v1714_v21 = vadd.f32 %v1713_v12, %v1712_v7  ;;  %v2189_v7 = vld [vmem:[%s2803_s4 + $0x18] sm:$0xff]   ;;  %s2274_s4 = smov [#allocation2]  }
 0x72b   :  { %2157 = vmatpush3.bf16.msra.mxu0 %v2189_v7  ;;  %s1968_s7 = sshll.u32 %s2274_s4, 4  ;;  %s1969_s7 = int_to_ptr.vmem [resolvable:$true] %s1968_s7 }
 0x72c   :  { %v1721_v23 = vadd.f32 %v1720_v1, %v1709_v20  ;;  %v1716_v25 = vadd.f32 %v1715_v22, %v1714_v21  ;;  %2158 = vmatprep.subr.bf16.mxu0 %v2265_v15  ;;  %s2241_s2 = scalar_lea.vmem %s1969_s7, 256  ;;  %p2246_p1 = scmp.lt.s32.totalorder %s1969_s7, %s1969_s7 }
 0x72d   :  { %p2242_p0 = scmp.ne.s32.totalorder %s1969_s7, %s2241_s2  ;;  %p2247_p2 = scmp.lt.s32.totalorder %s2241_s2, %s2241_s2 }
 0x72e   :  { %v1722_v16 = vadd.f32 %v1720_v1, %v1716_v25  ;;  %v2720_v27 = vadd.f32 %v2239_v62, %v1721_v23 }
 0x72f   :  { %2159 = vmatpush3.bf16.msra.mxu0 %v2190_v8  ;;  %p2248_p3 = por %p2247_p2, %p2246_p1 }
 0x730   :  { %v1725_v13 = vsel %vm39_vm0, %v2720_v27, 0.0  ;;  %v2727_v28 = vadd.f32 %v2240_v26, %v1722_v16  ;;  %2160 = vmatprep.subr.bf16.mxu0 %v2265_v15 }
 0x731   :  { %1726 = vadd.xlane.f32.xlu0 %v1725_v13  ;;  %p2249_p4 = pnand %p2248_p3, %p2242_p0 }
 0x732   :  { %v1728_v29 = vsel %vm39_vm0, %v2727_v28, 0.0 }
 0x733   :  { %1729 = vadd.xlane.f32.xlu1 %v1728_v29  ;;  %2161 = vmatpush3.bf16.msra.mxu0 %v2191_v9 }
 0x734   :  { %2162 = vmatprep.subr.bf16.mxu0 %v2265_v15 }
 0x737   :  { %2163 = vmatpush3.bf16.msra.mxu0 %v2192_v63 }
 0x738   :  { %2164 = vmatprep.subr.bf16.mxu0 %v2265_v15 }
 0x73b   :  { %2165 = vmatpush3.bf16.msra.mxu0 %v2193_v0 }
 0x7be   :  { %v1727_v30 = vpop.xlane.xlu0 %1726 }
 0x7bf   :  { %v1731_v31 = vmul.f32 0.03125, %v1727_v30 }
 0x7c0   :  { %v1730_v32 = vpop.xlane.xlu1 %1729 }
 0x7c1   :  { %v1733_v52 = vsub.f32 %v2720_v27, %v1731_v31  ;;  %v1732_v33 = vmul.f32 0.03125, %v1730_v32 }
 0x7c3   :  { %v1734_v34 = vsub.f32 %v2727_v28, %v1732_v33  ;;  %v1735_v35 = vmul.f32 %v1733_v52, %v1733_v52 }
 0x7c5   :  { %v1737_v40 = vsel %vm39_vm0, %v1735_v35, 0.0  ;;  %v1736_v42 = vmul.f32 %v1734_v34, %v1734_v34 }
 0x7c6   :  { %1738 = vadd.xlane.f32.xlu0 %v1737_v40 }
 0x7c7   :  { %v1740_v55 = vsel %vm39_vm0, %v1736_v42, 0.0 }
 0x7c8   :  { %1741 = vadd.xlane.f32.xlu1 %v1740_v55 }
 0x853   :  { %v1739_v37 = vpop.xlane.xlu0 %1738 }
 0x854   :  { %v1743_v38 = vmul.f32 0.03125, %v1739_v37 }
 0x855   :  { %v1742_v39 = vpop.xlane.xlu1 %1741 }
 0x856   :  { %v1745_v45 = vadd.f32 1e-05, %v1743_v38  ;;  %v1744_v47 = vmul.f32 0.03125, %v1742_v39 }
 0x858   :  { %2230 = vrsqrt.f32 %v1745_v45  ;;  %v1746_v43 = vadd.f32 1e-05, %v1744_v47 }
 0x85a   :  { %2232 = vrsqrt.f32 %v1746_v43 }
 0x862   :  { %v2231_v54 = vpop.eup %2230 }
 0x863   :  { %v1749_v46 = vmul.f32 %v2231_v54, %v1733_v52 }
 0x864   :  { %v2233_v61 = vpop.eup %2232 }
 0x865   :  { %v1755_v56 = vmul.f32 %v1754_v44, %v1749_v46  ;;  %v1750_v57 = vmul.f32 %v2233_v61, %v1734_v34  ;;  %v1868_v34 = vsub.s32 5, %v2356_v24 }
 0x867   :  { %v1756_v59 = vmul.f32 %v1754_v44, %v1750_v57  ;;  %v1761_v60 = vadd.f32 %v1760_v48, %v1755_v56  ;;  %v1869_v35 = vrot.slane %v2711_v19, %v1868_v34 }
 0x869   :  { %v1762_v51 = vadd.f32 %v1760_v48, %v1756_v59 }
 0x86b   :  { %v1763_v2 = vpack.c.bf16 %v1762_v51, %v1761_v60 }
 0x86d   :  { %2147 = vmatmul.mubr.msk.bf16.vlgmr.msra.gmra.mrb[32].mxu1 %vm39_vm0, %v1763_v2 }
 0x940   :  { %v1824_v6 = vpop.f32.mrb[32].mxu1 }
 0x941   :  { %v1825_v14 = vadd.f32 %v2011_v10, %v1824_v6  ;;  %v2148_v17 = vpop.f32.mrb[33].mxu1 }
 0x942   :  { %v1827_v53 = vpop.f32.mrb[34].mxu1 }
 0x943   :  { %v1833_v1 = vmul.f32 0.044715, %v1825_v14  ;;  %v1828_v58 = vadd.f32 %v2011_v10, %v1827_v53  ;;  %v2149_v11 = vpop.f32.mrb[35].mxu1  ;;  %v1831_v29 = vmul.f32 0.5, %v1825_v14 }
 0x945   :  { %v1835_v12 = vmul.f32 %v1833_v1, %v1825_v14  ;;  %v1834_v18 = vmul.f32 0.044715, %v1828_v58  ;;  %v1832_v30 = vmul.f32 0.5, %v1828_v58 }
 0x947   :  { %v1837_v20 = vmul.f32 %v1835_v12, %v1825_v14  ;;  %v1836_v21 = vmul.f32 %v1834_v18, %v1828_v58 }
 0x949   :  { %v1839_v22 = vadd.f32 %v1837_v20, %v1825_v14  ;;  %v1838_v23 = vmul.f32 %v1836_v21, %v1828_v58 }
 0x94b   :  { %v1841_v25 = vmul.f32 0.7978846, %v1839_v22  ;;  %v1840_v15 = vadd.f32 %v1838_v23, %v1828_v58 }
 0x94d   :  { %2234 = vtanh.f32 %v1841_v25  ;;  %v1842_v16 = vmul.f32 0.7978846, %v1840_v15 }
 0x94f   :  { %2236 = vtanh.f32 %v1842_v16 }
 0x957   :  { %v2235_v62 = vpop.eup %2234 }
 0x958   :  { %v1845_v13 = vadd.f32 1.0, %v2235_v62 }
 0x959   :  { %v2237_v26 = vpop.eup %2236 }
 0x95a   :  { %v1846_v31 = vadd.f32 1.0, %v2237_v26  ;;  %v1847_v32 = vmul.f32 %v1845_v13, %v1831_v29 }
 0x95c   :  { %v1848_v52 = vmul.f32 %v1846_v31, %v1832_v30 }
 0x95e   :  { %v1849_v33 = vpack.c.bf16 %v1848_v52, %v1847_v32 }
 0x960   :  { %2167 = vmatmul.mubr.bf16.vlgmr.msra.gmra.mrb[20].mxu0 %v1849_v33 }
 0xa33   :  { %v1952_v40 = vpop.f32.mrb[20].mxu0 }
 0xa34   :  { %v1953_v42 = vadd.f32 %v1952_v40, %v1869_v35  ;;  %v2168_v55 = vpop.f32.mrb[21].mxu0 }
 0xa35   :  { %v1955_v50 = vpop.f32.mrb[22].mxu0 }
 0xa36   :  { %v1959_v36 = vadd.f32 %v1953_v42, %v2720_v27  ;;  %v1956_v37 = vadd.f32 %v1955_v50, %v1869_v35  ;;  %v2169_v38 = vpop.f32.mrb[23].mxu0 }
 0xa38   :  { %1961 = vst.msk [vmem:[#allocation2] sm:$0xff] %vm39_vm0, %v1959_v36  ;;  %v1960_v39 = vadd.f32 %v1956_v37, %v2727_v28 }
 0xa3a   :  { %1962 = vst.msk [vmem:[#allocation2 + $0x8] sm:$0xff] %vm39_vm0, %v1960_v39 }
 0xa3b   :  { %2252 = shalt.err (!%p2249_p4)
}
 0xa3c   :  { %s2253_s23 = scalar_lea.hbm %s2808_s9, 256 }
 0xa3d   :  { %p2254_p5 = scmp.ne.s32.totalorder %s2808_s9, %s2253_s23  ;;  %p2257_p6 = scmp.lt.u32.totalorder %s2253_s23, %s2808_s9 }
 0xa3f   :  { %p2259_p7 = pnand %p2257_p6, %p2254_p5 }
 0xa41   :  { %2262 = shalt.err (!%p2259_p7)
}
 0xa42   :  { %s2275_s26 = smov 128   ;;  %s2276_s6 = smov 8  }
 0xa43   :  { %1974 = dma.vmem_to_hbm [thread:$0]  %s1969_s7, 256, %s2808_s9, [#allocation3], %s2275_s26, %s2275_s26, %s2276_s6  }
 0xa44   :  { %2263 = dma.done.wait [#allocation3], 256  }
 0xa45   :  { %2264 = vsyncadd [#allocation3], 4294967040 }
 0xa46   :  { %1982 = vsyncpa [#allocation3], 1 }

</bundles_post_ra>
